<compile_context>
chip_gen: v7x
topology: tpu7x:2x2x1
jax: 0.10.0
libtpu: 0.0.40
codegen_flags: <defaults>
</compile_context>

<pallas_src>
import functools

import jax
import jax.numpy as jnp
from jax.experimental import pallas as pl
from jax.experimental.pallas import tpu as pltpu

_LANE = 128


def _sigmoid(z):
    # Explicit logistic; exp lowers to the EUP and saturates correctly.
    return 1.0 / (1.0 + jnp.exp(-z))


def _nkn_kernel(x_ref, w1_ref, b1_ref, w2_ref, b2_ref, w3_ref, b3_ref, o_ref):
    """One batch tile. All intermediates keep batch on the lane (last) axis.

    x_ref:  [bb, D]  f32     w1_ref: [32, D] bf16   b1_ref: [32, 1] f32
    w2_ref: [16, 32] f32     b2_ref: [16, 1] f32
    w3_ref: [16, 1]  f32     b3_ref: [1, 1]  f32    o_ref:  [1, bb] f32
    """
    # Cast x to bf16 on the VPU (hidden under the x DMA); x is read from HBM
    # exactly once, in f32.
    x = x_ref[...].astype(jnp.bfloat16)                               # [bb, D]

    # Layer 1: h1[o, b] = sum_d w1[o, d] * x[b, d]  ->  [32, bb] (f32 acc).
    # lhs contracts its last dim, rhs contracts its last dim (transposed-rhs
    # MXU-native form, same as q @ k.T), so the large x tile is never
    # transposed through the XLU.
    h1 = jax.lax.dot_general(
        w1_ref[...], x,
        dimension_numbers=(((1,), (1,)), ((), ())),
        preferred_element_type=jnp.float32)
    h1 = _sigmoid(h1 + b1_ref[...])                                   # [32, bb]

    # Layer 2: [16, 32] @ [32, bb] -> [16, bb] (plain NN matmul, f32).
    h2 = jax.lax.dot_general(
        w2_ref[...], h1,
        dimension_numbers=(((1,), (0,)), ((), ())),
        preferred_element_type=jnp.float32)
    h2 = _sigmoid(h2 + b2_ref[...])                                   # [16, bb]

    # Head Linear(16 -> 1): broadcast multiply + 16-row sublane reduction
    # (VPU/XLU), avoiding an M=1 MXU matmul. Result is lane-dense [1, bb].
    out = jnp.sum(h2 * w3_ref[...], axis=0, keepdims=True) + b3_ref[...]
    o_ref[...] = out.astype(o_ref.dtype)


def _vmem_capacity_bytes():
    try:
        return int(pltpu.get_tpu_info().vmem_capacity_bytes)
    except Exception:
        return 64 * 1024 * 1024  # v7x per-TC VMEM: safe lower bound everywhere


def _pick_block_b(batch, d, vmem_bytes, itemsize=4):
    """Batch tile, chosen from an x-tile byte budget, not a fixed row cap."""
    if batch <= 4 * _LANE:            # small batch: one full tile, one grid step
        return int(batch)
    row_bytes = d * itemsize
    # Target ~4 MiB of x per grid step (~10x the ~0.35 us per-step overhead).
    bb = (4 * 1024 * 1024) // row_bytes
    # VMEM cap: double-buffered f32 x tile + in-kernel f32/bf16 temporaries +
    # f32 h1/h2 intermediates + output buffers inside ~60% of this
    # generation's VMEM (64 MiB on v7x, 128 MiB on v5e/v6e).
    per_row = 3 * row_bytes + row_bytes // 2 + (32 + 16) * 4 * 2 + 2 * 4
    bb = min(bb, int(vmem_bytes * 0.6) // per_row)
    # Keep >= 4 grid steps when the batch allows (2 per v7x TensorCore).
    bb = min(bb, max(_LANE, batch // 4))
    bb = max(_LANE, (bb // _LANE) * _LANE)   # aligned, lane-dense output tiles
    return int(min(bb, batch))


def _vmem_limit_bytes(block_b, d, vmem_bytes, itemsize=4):
    """Scoped-VMEM request derived from the actual buffer sizes (with slack)."""
    x_bytes = block_b * d * itemsize
    est = 2 * x_bytes                    # double-buffered f32 x tile
    est += x_bytes + x_bytes // 2        # in-kernel f32 load / bf16 temporaries
    est += block_b * (32 + 16) * 4 * 2   # h1/h2 intermediates (+slack)
    est += 4 * block_b * 4               # (1, block_b) output buffers
    est += 2 * 1024 * 1024               # weights, biases, misc
    est = max(est, 16 * 1024 * 1024)
    return int(min(est, int(vmem_bytes * 0.9)))


@functools.partial(jax.jit, static_argnames=("block_b", "vmem_limit"))
def _nkn_forward_impl(x, w1, b1, w2, b2, w3_col, b3, *, block_b, vmem_limit):
    B, D = x.shape
    grid = (pl.cdiv(B, block_b),)

    def _full(a):  # grid-invariant block: constant index -> fetched once
        return pl.BlockSpec(a.shape, lambda i: (0, 0))

    out_t = pl.pallas_call(
        _nkn_kernel,
        out_shape=jax.ShapeDtypeStruct((1, B), jnp.float32),
        grid_spec=pltpu.PrefetchScalarGridSpec(
            num_scalar_prefetch=0,
            grid=grid,
            in_specs=[
                pl.BlockSpec((block_b, D), lambda i: (i, 0)),  # x tile (f32)
                _full(w1), _full(b1),
                _full(w2), _full(b2),
                _full(w3_col), _full(b3),
            ],
            # Lane-dense output: batch on lanes -> unmasked vector stores.
            out_specs=pl.BlockSpec((1, block_b), lambda i: (0, i)),
        ),
        compiler_params=pltpu.CompilerParams(
            dimension_semantics=("parallel",),
            vmem_limit_bytes=vmem_limit),
    )(x, w1, b1, w2, b2, w3_col, b3)

    # (1, B) and (B, 1) share the same linear layout -> free reshape.
    return out_t.reshape(B, 1)


def nkn_forward(x, params):
    """Forward pass of NKNModel.

    x: [B, D] float32
    params (PyTorch [out, in] layout): w1 [32,D], b1 [32,1], w2 [16,32],
    b2 [16,1], w3 [1,16], b3 [1,1].
    """
    B, D = x.shape
    vmem_cap = _vmem_capacity_bytes()
    block_b = _pick_block_b(B, D, vmem_cap)
    vmem_limit = _vmem_limit_bytes(block_b, D, vmem_cap)

    w1 = params["w1"].astype(jnp.bfloat16)   # tiny, cast once in the wrapper
    w3_col = params["w3"].reshape(16, 1)     # head weight as a column (free)
    return _nkn_forward_impl(
        x, w1, params["b1"], params["w2"], params["b2"], w3_col, params["b3"],
        block_b=block_b, vmem_limit=vmem_limit)


def init_params(key, input_dim):
    """PyTorch-style init: U(-1/sqrt(fan_in), 1/sqrt(fan_in)); weights [out, in]."""
    def linear(k, fan_in, fan_out):
        kw, kb = jax.random.split(k)
        bound = 1.0 / (fan_in ** 0.5)
        w = jax.random.uniform(kw, (fan_out, fan_in), jnp.float32, -bound, bound)
        b = jax.random.uniform(kb, (fan_out, 1), jnp.float32, -bound, bound)
        return w, b

    k1, k2, k3 = jax.random.split(key, 3)
    w1, b1 = linear(k1, input_dim, 32)   # [32, D]
    w2, b2 = linear(k2, 32, 16)          # [16, 32]
    w3, b3 = linear(k3, 16, 1)           # [1, 16]
    return dict(w1=w1, b1=b1, w2=w2, b2=b2, w3=w3, b3=b3)


def nkn_reference(x, p):
    """Pure-JAX reference mirroring the kernel's precision choices."""
    h1 = _sigmoid(
        jnp.dot(x.astype(jnp.bfloat16), p["w1"].T.astype(jnp.bfloat16),
                preferred_element_type=jnp.float32) + p["b1"].T)
    h2 = _sigmoid(
        jnp.dot(h1, p["w2"].T, preferred_element_type=jnp.float32) + p["b2"].T)
    return jnp.dot(h2, p["w3"].T, preferred_element_type=jnp.float32) + p["b3"].T


if __name__ == "__main__":
    key = jax.random.PRNGKey(0)
    kx, kp = jax.random.split(key)

    input_dim = 64
    params = init_params(kp, input_dim)

    # batch=256 exercises the single-tile path; batch=1024 the multi-step grid.
    for batch in (256, 1024):
        x = jax.random.normal(jax.random.fold_in(kx, batch),
                              (batch, input_dim), jnp.float32)
        out = jax.block_until_ready(nkn_forward(x, params))
        ref = nkn_reference(x, params)
        assert out.shape == (batch, 1), out.shape
        err = float(jnp.max(jnp.abs(out - ref)))
        # bf16 layer-1 inputs are a deliberate precision tradeoff vs pure f32.
        assert err < 2e-2, err

    print("KERNEL_OK")
</pallas_src>

<mosaic_0001>
module attributes {stable_mosaic.version = 11 : i64} {
  func.func @_nkn_kernel(%arg0: i32, %arg1: memref<256x64xf32, #tpu.memory_space<vmem>>, %arg2: memref<32x64xbf16, #tpu.memory_space<vmem>>, %arg3: memref<32x1xf32, #tpu.memory_space<vmem>>, %arg4: memref<16x32xf32, #tpu.memory_space<vmem>>, %arg5: memref<16x1xf32, #tpu.memory_space<vmem>>, %arg6: memref<16x1xf32, #tpu.memory_space<vmem>>, %arg7: memref<1x1xf32, #tpu.memory_space<vmem>>, %arg8: memref<1x256xf32, #tpu.memory_space<vmem>>) attributes {dimension_semantics = [#tpu.dimension_semantics<parallel>], iteration_bounds = array<i64: 1>, scalar_prefetch = 0 : i64, scratch_operands = 0 : i64, tpu.core_type = #tpu.core_type<tc>, window_params = [{transform_indices = @transform_0, window_bounds = array<i64: 256, 64>}, {pipeline_mode = #tpu.pipeline_mode<synchronous>, transform_indices = @transform_1, window_bounds = array<i64: 32, 64>}, {pipeline_mode = #tpu.pipeline_mode<synchronous>, transform_indices = @transform_2, window_bounds = array<i64: 32, 1>}, {pipeline_mode = #tpu.pipeline_mode<synchronous>, transform_indices = @transform_3, window_bounds = array<i64: 16, 32>}, {pipeline_mode = #tpu.pipeline_mode<synchronous>, transform_indices = @transform_4, window_bounds = array<i64: 16, 1>}, {pipeline_mode = #tpu.pipeline_mode<synchronous>, transform_indices = @transform_5, window_bounds = array<i64: 16, 1>}, {pipeline_mode = #tpu.pipeline_mode<synchronous>, transform_indices = @transform_6, window_bounds = array<i64: 1, 1>}, {transform_indices = @transform_7, window_bounds = array<i64: 1, 256>}]} {
    %c0 = arith.constant 0 : index
    %c0_0 = arith.constant 0 : index
    %0 = vector.load %arg1[%c0, %c0_0] : memref<256x64xf32, #tpu.memory_space<vmem>>, vector<256x64xf32>
    %1 = arith.truncf %0 : vector<256x64xf32> to vector<256x64xbf16>
    %c0_1 = arith.constant 0 : index
    %c0_2 = arith.constant 0 : index
    %2 = vector.load %arg2[%c0_1, %c0_2] : memref<32x64xbf16, #tpu.memory_space<vmem>>, vector<32x64xbf16>
    %cst = arith.constant dense<0.000000e+00> : vector<32x256xf32>
    %3 = tpu.matmul %2, %1, %cst {dimension_numbers = #tpu.dot_dimension_numbers<[1], [1], [0], [0], [0, 0, 1, 0], [], []>} : vector<32x64xbf16>, vector<256x64xbf16>, vector<32x256xf32> -> vector<32x256xf32>
    %c0_3 = arith.constant 0 : index
    %c0_4 = arith.constant 0 : index
    %4 = vector.load %arg3[%c0_3, %c0_4] : memref<32x1xf32, #tpu.memory_space<vmem>>, vector<32x1xf32>
    %5 = vector.broadcast %4 : vector<32x1xf32> to vector<32x256xf32>
    %6 = arith.addf %3, %5 : vector<32x256xf32>
    %cst_5 = arith.constant 0.000000e+00 : f32
    %7 = vector.broadcast %cst_5 : f32 to vector<32x256xf32>
    %8 = arith.subf %7, %6 : vector<32x256xf32>
    %9 = math.exp %8 : vector<32x256xf32>
    %cst_6 = arith.constant 1.000000e+00 : f32
    %10 = vector.broadcast %cst_6 : f32 to vector<32x256xf32>
    %11 = arith.addf %10, %9 : vector<32x256xf32>
    %cst_7 = arith.constant 1.000000e+00 : f32
    %12 = vector.broadcast %cst_7 : f32 to vector<32x256xf32>
    %13 = arith.divf %12, %11 : vector<32x256xf32>
    %c0_8 = arith.constant 0 : index
    %c0_9 = arith.constant 0 : index
    %14 = vector.load %arg4[%c0_8, %c0_9] : memref<16x32xf32, #tpu.memory_space<vmem>>, vector<16x32xf32>
    %cst_10 = arith.constant dense<0.000000e+00> : vector<16x256xf32>
    %15 = tpu.matmul %14, %13, %cst_10 {dimension_numbers = #tpu.dot_dimension_numbers<[1], [0], [0], [1], [0, 0, 1, 1], [], []>} : vector<16x32xf32>, vector<32x256xf32>, vector<16x256xf32> -> vector<16x256xf32>
    %c0_11 = arith.constant 0 : index
    %c0_12 = arith.constant 0 : index
    %16 = vector.load %arg5[%c0_11, %c0_12] : memref<16x1xf32, #tpu.memory_space<vmem>>, vector<16x1xf32>
    %17 = vector.broadcast %16 : vector<16x1xf32> to vector<16x256xf32>
    %18 = arith.addf %15, %17 : vector<16x256xf32>
    %cst_13 = arith.constant 0.000000e+00 : f32
    %19 = vector.broadcast %cst_13 : f32 to vector<16x256xf32>
    %20 = arith.subf %19, %18 : vector<16x256xf32>
    %21 = math.exp %20 : vector<16x256xf32>
    %cst_14 = arith.constant 1.000000e+00 : f32
    %22 = vector.broadcast %cst_14 : f32 to vector<16x256xf32>
    %23 = arith.addf %22, %21 : vector<16x256xf32>
    %cst_15 = arith.constant 1.000000e+00 : f32
    %24 = vector.broadcast %cst_15 : f32 to vector<16x256xf32>
    %25 = arith.divf %24, %23 : vector<16x256xf32>
    %c0_16 = arith.constant 0 : index
    %c0_17 = arith.constant 0 : index
    %26 = vector.load %arg6[%c0_16, %c0_17] : memref<16x1xf32, #tpu.memory_space<vmem>>, vector<16x1xf32>
    %27 = vector.broadcast %26 : vector<16x1xf32> to vector<16x256xf32>
    %28 = arith.mulf %25, %27 : vector<16x256xf32>
    %cst_18 = arith.constant dense<0.000000e+00> : vector<256xf32>
    %29 = vector.multi_reduction <add>, %28, %cst_18 [0] : vector<16x256xf32> to vector<256xf32>
    %30 = vector.shape_cast %29 : vector<256xf32> to vector<1x256xf32>
    %c0_19 = arith.constant 0 : index
    %c0_20 = arith.constant 0 : index
    %31 = vector.load %arg7[%c0_19, %c0_20] : memref<1x1xf32, #tpu.memory_space<vmem>>, vector<1x1xf32>
    %32 = vector.broadcast %31 : vector<1x1xf32> to vector<1x256xf32>
    %33 = arith.addf %30, %32 : vector<1x256xf32>
    %c0_21 = arith.constant 0 : index
    %c0_22 = arith.constant 0 : index
    %34 = vector.load %arg8[%c0_21, %c0_22] : memref<1x256xf32, #tpu.memory_space<vmem>>, vector<1x256xf32>
    tpu.vector_store %arg8[%c0_21, %c0_22], %33 {strides = array<i32>} : memref<1x256xf32, #tpu.memory_space<vmem>>, vector<1x256xf32>,
    return
  }
  func.func @transform_0(%arg0: i32) -> (i32, i32) {
    %c0_i32 = arith.constant 0 : i32
    %c0_i32_0 = arith.constant 0 : i32
    return %arg0, %c0_i32 : i32, i32
  }
  func.func @transform_1(%arg0: i32) -> (i32, i32) {
    %c0_i32 = arith.constant 0 : i32
    %c0_i32_0 = arith.constant 0 : i32
    %c0_i32_1 = arith.constant 0 : i32
    return %c0_i32, %c0_i32_0 : i32, i32
  }
  func.func @transform_2(%arg0: i32) -> (i32, i32) {
    %c0_i32 = arith.constant 0 : i32
    %c0_i32_0 = arith.constant 0 : i32
    %c0_i32_1 = arith.constant 0 : i32
    return %c0_i32, %c0_i32_0 : i32, i32
  }
  func.func @transform_3(%arg0: i32) -> (i32, i32) {
    %c0_i32 = arith.constant 0 : i32
    %c0_i32_0 = arith.constant 0 : i32
    %c0_i32_1 = arith.constant 0 : i32
    return %c0_i32, %c0_i32_0 : i32, i32
  }
  func.func @transform_4(%arg0: i32) -> (i32, i32) {
    %c0_i32 = arith.constant 0 : i32
    %c0_i32_0 = arith.constant 0 : i32
    %c0_i32_1 = arith.constant 0 : i32
    return %c0_i32, %c0_i32_0 : i32, i32
  }
  func.func @transform_5(%arg0: i32) -> (i32, i32) {
    %c0_i32 = arith.constant 0 : i32
    %c0_i32_0 = arith.constant 0 : i32
    %c0_i32_1 = arith.constant 0 : i32
    return %c0_i32, %c0_i32_0 : i32, i32
  }
  func.func @transform_6(%arg0: i32) -> (i32, i32) {
    %c0_i32 = arith.constant 0 : i32
    %c0_i32_0 = arith.constant 0 : i32
    %c0_i32_1 = arith.constant 0 : i32
    return %c0_i32, %c0_i32_0 : i32, i32
  }
  func.func @transform_7(%arg0: i32) -> (i32, i32) {
    %c0_i32 = arith.constant 0 : i32
    %c0_i32_0 = arith.constant 0 : i32
    return %c0_i32, %arg0 : i32, i32
  }
}

</mosaic_0001>

<bundles_post_ra>
// kernel: _nkn_forward_impl.1
= control target key start
LH: loop header
LB: loop body
LE: loop exit
PB: predicated region body
PF: predicated region fallthrough
CT: control target
= control target key end

     0   :  { %s812_s0 = inlined_call_operand.vmem [shape: f32[256,64], index: 0, kind: input, shape index: {}]   ;;  %s813_s1 = inlined_call_operand.vmem [shape: bf16[32,64], index: 1, kind: input, shape index: {}]   ;;  %s814_s2 = inlined_call_operand.vmem [shape: f32[32,1], index: 2, kind: input, shape index: {}]   ;;  %s815_s3 = inlined_call_operand.vmem [shape: f32[16,32], index: 3, kind: input, shape index: {}]   ;;  %s816_s4 = inlined_call_operand.vmem [shape: f32[16,1], index: 4, kind: input, shape index: {}]   ;;  %s817_s5 = inlined_call_operand.vmem [shape: f32[16,1], index: 5, kind: input, shape index: {}]   ;;  %s818_s6 = inlined_call_operand.<no memory space> [shape: f32[1,1], index: 6, kind: input, shape index: {}]   ;;  %s819_s7 = inlined_call_operand.hbm [shape: f32[1,256], index: 7, kind: output, shape index: {}]  }
   0x1   :  { %v12_v0 = vstv %s818_s6 }
   0x2   :  { %13 = vst [vmem:[#allocation2] sm:$0x1] %v12_v0 }
   0x3   :  { %v46_v1 = vld [vmem:[%s812_s0 + $0x80] sm:$0xff]  ;;  %v47_v2 = vld [vmem:[%s812_s0 + $0x88] sm:$0xff]  ;;  %vm116_vm0 = vcmask 523264   ;;  %v48_v6 = vld [vmem:[%s812_s0 + $0x90] sm:$0xff]  ;;  %v595_v8 = vmov 0  }
   0x4   :  { %v30_v3 = vld [vmem:[%s812_s0] sm:$0xff]  ;;  %v70_v4 = vpack.c.bf16 %v47_v2, %v46_v1  ;;  %v31_v5 = vld [vmem:[%s812_s0 + $0x8] sm:$0xff]  ;;  %v49_v7 = vld [vmem:[%s812_s0 + $0x98] sm:$0xff]  ;;  %519 = vset.pattern.permute.xlu0 %v595_v8  ;;  %520 = vset.pattern.permute.xlu1 %v595_v8 }
   0x5   :  { %v62_v9 = vpack.c.bf16 %v31_v5, %v30_v3  ;;  %v71_v10 = vpack.c.bf16 %v49_v7, %v48_v6  ;;  %v32_v11 = vld [vmem:[%s812_s0 + $0x10] sm:$0xff]  ;;  %v33_v12 = vld [vmem:[%s812_s0 + $0x18] sm:$0xff]  ;;  %v50_v15 = vld [vmem:[%s812_s0 + $0xa0] sm:$0xff] }
   0x6   :  { %507 = vmatprep.subr.msk.bf16.mxu0 %vm116_vm0, %v70_v4  ;;  %v63_v14 = vpack.c.bf16 %v33_v12, %v32_v11  ;;  %v51_v16 = vld [vmem:[%s812_s0 + $0xa8] sm:$0xff]  ;;  %v34_v19 = vld [vmem:[%s812_s0 + $0x20] sm:$0xff]  ;;  %v84_v23 = vld [vmem:[%s814_s2 + $0x10] sm:$0xff] }
   0x7   :  { %v124_v13 = vsel %vm116_vm0, %v62_v9, 0  ;;  %v72_v18 = vpack.c.bf16 %v51_v16, %v50_v15  ;;  %v35_v20 = vld [vmem:[%s812_s0 + $0x28] sm:$0xff]  ;;  %v685_v21 = vld [vmem:[%s813_s1] sm:$0xff]   ;;  %v52_v25 = vld [vmem:[%s812_s0 + $0xb0] sm:$0xff]  ;;  %98 = vperm.xlu1 %520, %v84_v23  }
   0x8   :  { %480 = vmatpush3.bf16.xpose.msra.mxu0 %v124_v13  ;;  %v127_v17 = vsel %vm116_vm0, %v63_v14, 0  ;;  %v82_v22 = vld [vmem:[%s814_s2] sm:$0xff]  ;;  %495 = vmatprep.mubr.msk.bf16.mxu0 %vm116_vm0, %v685_v21  ;;  %v64_v24 = vpack.c.bf16 %v35_v20, %v34_v19  ;;  %v53_v26 = vld [vmem:[%s812_s0 + $0xb8] sm:$0xff]  ;;  %v83_v27 = vld [vmem:[%s814_s2 + $0x8] sm:$0xff] }
   0x9   :  { %508 = vmatprep.subr.msk.bf16.mxu0 %vm116_vm0, %v71_v10  ;;  %88 = vperm.xlu0 %519, %v82_v22  }
  0x10   :  { %482 = vmatpush3.bf16.xpose.msra.mxu0 %v127_v17 }
  0x11   :  { %509 = vmatprep.subr.msk.bf16.mxu0 %vm116_vm0, %v72_v18 }
  0x12   :  { %14 = vsyncpa [#allocation4], 0  ;;  %v85_v28 = vld [vmem:[%s814_s2 + $0x18] sm:$0xff]  ;;  %v130_v29 = vsel %vm116_vm0, %v64_v24, 0  ;;  %v73_v30 = vpack.c.bf16 %v53_v26, %v52_v25  ;;  %93 = vperm.xlu0 %519, %v83_v27   ;;  %v36_v31 = vld [vmem:[%s812_s0 + $0x30] sm:$0xff]  ;;  %v596_v5 = vmov 0.0  }
  0x13   :  { %v37_v32 = vld [vmem:[%s812_s0 + $0x38] sm:$0xff]  ;;  %v274_v33 = vld [vmem:[%s816_s4] sm:$0xff]  ;;  %103 = vperm.xlu1 %520, %v85_v28   ;;  %v275_v34 = vld [vmem:[%s816_s4 + $0x8] sm:$0xff]  ;;  %357 = vmatprep.mubr.f32.mxu1 %v596_v5  ;;  %vm286_vm1 = vcmask 261120  }
  0x14   :  { %v65_v35 = vpack.c.bf16 %v37_v32, %v36_v31  ;;  %v54_v36 = vld [vmem:[%s812_s0 + $0xc0] sm:$0xff]  ;;  %v55_v37 = vld [vmem:[%s812_s0 + $0xc8] sm:$0xff]  ;;  %v56_v46 = vld [vmem:[%s812_s0 + $0xd0] sm:$0xff] }
  0x15   :  { %v394_v38 = vld [vmem:[%s817_s5] sm:$0xff]  ;;  %v395_v39 = vld [vmem:[%s817_s5 + $0x8] sm:$0xff]  ;;  %v74_v41 = vpack.c.bf16 %v55_v37, %v54_v36  ;;  %v57_v47 = vld [vmem:[%s812_s0 + $0xd8] sm:$0xff] }
  0x16   :  { %278 = vperm.xlu0 %519, %v274_v33   ;;  %v133_v40 = vsel %vm116_vm0, %v65_v35, 0  ;;  %v38_v42 = vld [vmem:[%s812_s0 + $0x40] sm:$0xff]  ;;  %v39_v43 = vld [vmem:[%s812_s0 + $0x48] sm:$0xff]  ;;  %v75_v49 = vpack.c.bf16 %v57_v47, %v56_v46  ;;  %v40_v50 = vld [vmem:[%s812_s0 + $0x50] sm:$0xff] }
  0x17   :  { %283 = vperm.xlu1 %520, %v275_v34   ;;  %v424_v44 = vld [vmem:[#allocation2] sm:$0x1]  ;;  %v66_v45 = vpack.c.bf16 %v39_v43, %v38_v42  ;;  %v41_v51 = vld [vmem:[%s812_s0 + $0x58] sm:$0xff]  ;;  %v59_v54 = vld [vmem:[%s812_s0 + $0xe8] sm:$0xff] }
  0x18   :  { %484 = vmatpush3.bf16.xpose.msra.mxu0 %v130_v29  ;;  %v67_v52 = vpack.c.bf16 %v41_v51, %v40_v50  ;;  %v58_v53 = vld [vmem:[%s812_s0 + $0xe0] sm:$0xff]  ;;  %v43_v58 = vld [vmem:[%s812_s0 + $0x68] sm:$0xff]  ;;  %v60_v60 = vld [vmem:[%s812_s0 + $0xf0] sm:$0xff] }
  0x19   :  { %510 = vmatprep.subr.msk.bf16.mxu0 %vm116_vm0, %v73_v30  ;;  %v136_v48 = vsel %vm116_vm0, %v66_v45, 0  ;;  %v76_v56 = vpack.c.bf16 %v59_v54, %v58_v53  ;;  %v42_v57 = vld [vmem:[%s812_s0 + $0x60] sm:$0xff]  ;;  %v61_v61 = vld [vmem:[%s812_s0 + $0xf8] sm:$0xff]  ;;  %v44_v0 = vld [vmem:[%s812_s0 + $0x70] sm:$0xff] }
  0x1a   :  { %398 = vperm.xlu0 %519, %v394_v38   ;;  %v139_v55 = vsel %vm116_vm0, %v67_v52, 0  ;;  %v68_v59 = vpack.c.bf16 %v43_v58, %v42_v57  ;;  %v77_v63 = vpack.c.bf16 %v61_v61, %v60_v60  ;;  %v45_v1 = vld [vmem:[%s812_s0 + $0x78] sm:$0xff]  ;;  %v522_v4 = vld [vmem:[%s813_s1 + $0x8] sm:$0xff]  }
  0x1b   :  { %403 = vperm.xlu1 %520, %v395_v39   ;;  %v69_v2 = vpack.c.bf16 %v45_v1, %v44_v0 }
  0x1c   :  { %v142_v62 = vsel %vm116_vm0, %v68_v59, 0 }
  0x1d   :  { %v145_v3 = vsel %vm116_vm0, %v69_v2, 0 }
  0x1e   :  { %427 = vperm.xlu0 %519, %v424_v44  }
  0x20   :  { %486 = vmatpush3.bf16.xpose.msra.mxu0 %v133_v40 }
  0x21   :  { %511 = vmatprep.subr.msk.bf16.mxu0 %vm116_vm0, %v74_v41 }
  0x28   :  { %488 = vmatpush3.bf16.xpose.msra.mxu0 %v136_v48 }
  0x29   :  { %512 = vmatprep.subr.msk.bf16.mxu0 %vm116_vm0, %v75_v49 }
  0x30   :  { %490 = vmatpush3.bf16.xpose.msra.mxu0 %v139_v55 }
  0x31   :  { %513 = vmatprep.subr.msk.bf16.mxu0 %vm116_vm0, %v76_v56 }
  0x38   :  { %492 = vmatpush3.bf16.xpose.msra.mxu0 %v142_v62 }
  0x39   :  { %514 = vmatprep.subr.msk.bf16.mxu0 %vm116_vm0, %v77_v63 }
  0x40   :  { %494 = vmatpush3.bf16.xpose.msra.mxu0 %v145_v3 }
  0x47   :  { %496 = vmatmul.mubr.msk.bf16.vlgmr.msra.gmra.mrb[0].mxu0 %vm116_vm0, %v685_v21 }
  0x48   :  { %497 = vmatprep.mubr.msk.bf16.mxu0 %vm116_vm0, %v522_v4 }
  0x4f   :  { %498 = vmatmul.mubr.msk.bf16.gmra.mrb[4].mxu0 %vm116_vm0, %v522_v4 }
  0x86   :  { %v99_v16 = vpop.permute.xlu1 %98 }
  0x88   :  { %v89_v6 = vpop.permute.xlu0 %88 }
  0x91   :  { %v94_v10 = vpop.permute.xlu0 %93 }
  0x92   :  { %v104_v28 = vpop.permute.xlu1 %103 }
 0x11a   :  { %v205_v7 = vpop.f32.mrb[0].mxu0 }
 0x11b   :  { %v206_v8 = vadd.f32 %v205_v7, %v89_v6  ;;  %v207_v9 = vpop.f32.mrb[1].mxu0  ;;  %v272_v7 = vld [vmem:[%s815_s3] sm:$0xff] }
 0x11c   :  { %v208_v11 = vadd.f32 %v207_v9, %v89_v6  ;;  %v209_v12 = vpop.f32.mrb[2].mxu0  ;;  %v279_v9 = vpop.permute.xlu0 %278 }
 0x11d   :  { %v224_v13 = vsub.f32 0.0, %v206_v8  ;;  %v210_v14 = vadd.f32 %v209_v12, %v94_v10  ;;  %v211_v15 = vpop.f32.mrb[3].mxu0  ;;  %v273_v8 = vld [vmem:[%s815_s3 + $0x8] sm:$0xff]  ;;  %s598_s3 = smov [#allocation3]  }
 0x11e   :  { %v225_v17 = vsub.f32 0.0, %v208_v11  ;;  %v212_v18 = vadd.f32 %v211_v15, %v94_v10  ;;  %v284_v15 = vpop.permute.xlu1 %283  ;;  %s465_s6 = sshll.u32 %s598_s3, 4  ;;  %s466_s6 = int_to_ptr.vmem [resolvable:$true] %s465_s6 }
 0x11f   :  { %v232_v19 = vmul.f32 1.442695, %v224_v13  ;;  %v226_v20 = vsub.f32 0.0, %v210_v14  ;;  %s571_s11 = scalar_lea.vmem %s466_s6, 32  ;;  %p576_p1 = scmp.lt.s32.totalorder %s466_s6, %s466_s6 }
 0x120   :  { %v234_v21 = vmul.f32 1.442695, %v225_v17  ;;  %v227_v22 = vsub.f32 0.0, %v212_v18  ;;  %p572_p0 = scmp.ne.s32.totalorder %s466_s6, %s571_s11  ;;  %p577_p2 = scmp.lt.s32.totalorder %s571_s11, %s571_s11 }
 0x121   :  { %523 = vpow2.f32 %v232_v19  ;;  %v236_v23 = vmul.f32 1.442695, %v226_v20 }
 0x122   :  { %525 = vpow2.f32 %v234_v21  ;;  %v238_v24 = vmul.f32 1.442695, %v227_v22  ;;  %v215_v25 = vpop.f32.mrb[4].mxu0  ;;  %p578_p3 = por %p577_p2, %p576_p1 }
 0x123   :  { %527 = vpow2.f32 %v236_v23  ;;  %v216_v26 = vadd.f32 %v215_v25, %v99_v16  ;;  %v217_v27 = vpop.f32.mrb[5].mxu0 }
 0x124   :  { %529 = vpow2.f32 %v238_v24  ;;  %v218_v29 = vadd.f32 %v217_v27, %v99_v16  ;;  %v219_v30 = vpop.f32.mrb[6].mxu0  ;;  %p579_p4 = pnand %p578_p3, %p572_p0 }
 0x125   :  { %v228_v31 = vsub.f32 0.0, %v216_v26  ;;  %v220_v32 = vadd.f32 %v219_v30, %v104_v28  ;;  %v221_v33 = vpop.f32.mrb[7].mxu0 }
 0x126   :  { %v229_v34 = vsub.f32 0.0, %v218_v29  ;;  %v222_v35 = vadd.f32 %v221_v33, %v104_v28 }
 0x127   :  { %v240_v36 = vmul.f32 1.442695, %v228_v31  ;;  %v230_v37 = vsub.f32 0.0, %v220_v32 }
 0x128   :  { %v242_v38 = vmul.f32 1.442695, %v229_v34  ;;  %v231_v39 = vsub.f32 0.0, %v222_v35 }
 0x129   :  { %531 = vpow2.f32 %v240_v36  ;;  %v244_v40 = vmul.f32 1.442695, %v230_v37  ;;  %v399_v37 = vpop.permute.xlu0 %398 }
 0x12a   :  { %533 = vpow2.f32 %v242_v38  ;;  %v246_v41 = vmul.f32 1.442695, %v231_v39  ;;  %v404_v38 = vpop.permute.xlu1 %403 }
 0x12b   :  { %v524_v42 = vpop.eup %523  ;;  %535 = vpow2.f32 %v244_v40 }
 0x12c   :  { %v526_v43 = vpop.eup %525  ;;  %v248_v44 = vadd.f32 1.0, %v524_v42  ;;  %537 = vpow2.f32 %v246_v41 }
 0x12d   :  { %v528_v45 = vpop.eup %527  ;;  %v249_v46 = vadd.f32 1.0, %v526_v43 }
 0x12e   :  { %v530_v47 = vpop.eup %529  ;;  %539 = vrcp.f32 %v248_v44  ;;  %v250_v48 = vadd.f32 1.0, %v528_v45  ;;  %v430_v44 = vlaneseq }
 0x12f   :  { %541 = vrcp.f32 %v249_v46  ;;  %v251_v49 = vadd.f32 1.0, %v530_v47 }
 0x130   :  { %543 = vrcp.f32 %v250_v48  ;;  %vm456_vm2 = vcmp.lt.s32.totalorder %v430_v44, 256 }
 0x131   :  { %545 = vrcp.f32 %v251_v49  ;;  %v431_v49 = vshrl.u32 %v430_v44, 7 }
 0x133   :  { %v532_v50 = vpop.eup %531 }
 0x134   :  { %v534_v51 = vpop.eup %533  ;;  %v252_v52 = vadd.f32 1.0, %v532_v50 }
 0x135   :  { %v536_v53 = vpop.eup %535  ;;  %v253_v54 = vadd.f32 1.0, %v534_v51 }
 0x136   :  { %v538_v55 = vpop.eup %537  ;;  %547 = vrcp.f32 %v252_v52  ;;  %v254_v56 = vadd.f32 1.0, %v536_v53 }
 0x137   :  { %549 = vrcp.f32 %v253_v54  ;;  %v255_v57 = vadd.f32 1.0, %v538_v55  ;;  %v597_v54 = vmov 1966171168  }
 0x138   :  { %v540_v58 = vpop.eup %539  ;;  %551 = vrcp.f32 %v254_v56  ;;  %v440_v55 = vunpack.c.l.s4 %v597_v54  ;;  %v432_v56 = vsub.s32 0, %v431_v49 }
 0x139   :  { %v542_v59 = vpop.eup %541  ;;  %553 = vrcp.f32 %v255_v57 }
 0x13a   :  { %v544_v60 = vpop.eup %543 }
 0x13b   :  { %v546_v61 = vpop.eup %545  ;;  %v501_v62 = vpack.c.bf16 %v544_v60, %v540_v58  ;;  %v428_v58 = vpop.permute.xlu0 %427 }
 0x13c   :  { %v499_v63 = vpack.c.bf16 %v546_v61, %v542_v59 }
 0x13e   :  { %500 = vmatprep.subr.bf16.mxu1 %v499_v63  ;;  %v433_v63 = vrot.slane %v428_v58, %v432_v56 }
 0x13f   :  { %502 = vmatpush1.bf16.msra.mxu1 %v501_v62  ;;  %v441_v62 = vunpack.c.0.s8 %v440_v55 }
 0x140   :  { %v548_v0 = vpop.eup %547 }
 0x141   :  { %v550_v1 = vpop.eup %549 }
 0x142   :  { %v552_v2 = vpop.eup %551 }
 0x143   :  { %v554_v3 = vpop.eup %553  ;;  %v505_v4 = vpack.c.bf16 %v552_v2, %v548_v0 }
 0x144   :  { %v503_v6 = vpack.c.bf16 %v554_v3, %v550_v1 }
 0x146   :  { %504 = vmatprep.subr.bf16.mxu1 %v503_v6 }
 0x147   :  { %506 = vmatpush1.bf16.msra.mxu1 %v505_v4  ;;  %v444_v4 = vsub.s32 %v441_v62, %v431_v49 }
 0x14a   :  { %477 = vmatmul.mubr.msk.f32.vlgmr.msra.gmra.mrb[0].mxu1 %vm286_vm1, %v272_v7 }
 0x14b   :  { %363 = vmatprep.mubr.f32.mxu1 %v596_v5 }
 0x14e   :  { %478 = vmatmul.mubr.msk.f32.gmra.mrb[2].mxu1 %vm286_vm1, %v273_v8 }
 0x21d   :  { %v359_v10 = vpop.f32.mrb[0].mxu1 }
 0x21e   :  { %v360_v11 = vadd.f32 %v359_v10, %v279_v9  ;;  %v361_v12 = vpop.f32.mrb[1].mxu1 }
 0x21f   :  { %v362_v13 = vadd.f32 %v361_v12, %v279_v9 }
 0x220   :  { %v370_v14 = vsub.f32 0.0, %v360_v11 }
 0x221   :  { %v371_v16 = vsub.f32 0.0, %v362_v13  ;;  %v365_v17 = vpop.f32.mrb[2].mxu1 }
 0x222   :  { %v374_v18 = vmul.f32 1.442695, %v370_v14  ;;  %v366_v19 = vadd.f32 %v365_v17, %v284_v15  ;;  %v367_v20 = vpop.f32.mrb[3].mxu1 }
 0x223   :  { %v376_v21 = vmul.f32 1.442695, %v371_v16  ;;  %v368_v22 = vadd.f32 %v367_v20, %v284_v15 }
 0x224   :  { %555 = vpow2.f32 %v374_v18  ;;  %v372_v5 = vsub.f32 0.0, %v366_v19 }
 0x225   :  { %557 = vpow2.f32 %v376_v21  ;;  %v373_v23 = vsub.f32 0.0, %v368_v22 }
 0x226   :  { %v378_v24 = vmul.f32 1.442695, %v372_v5 }
 0x227   :  { %v380_v25 = vmul.f32 1.442695, %v373_v23 }
 0x228   :  { %559 = vpow2.f32 %v378_v24 }
 0x229   :  { %561 = vpow2.f32 %v380_v25 }
 0x22e   :  { %v556_v26 = vpop.eup %555 }
 0x22f   :  { %v558_v27 = vpop.eup %557  ;;  %v382_v28 = vadd.f32 1.0, %v556_v26 }
 0x230   :  { %v383_v29 = vadd.f32 1.0, %v558_v27 }
 0x231   :  { %563 = vrcp.f32 %v382_v28 }
 0x232   :  { %v560_v30 = vpop.eup %559  ;;  %565 = vrcp.f32 %v383_v29 }
 0x233   :  { %v562_v31 = vpop.eup %561  ;;  %v384_v32 = vadd.f32 1.0, %v560_v30 }
 0x234   :  { %v385_v33 = vadd.f32 1.0, %v562_v31 }
 0x235   :  { %567 = vrcp.f32 %v384_v32 }
 0x236   :  { %569 = vrcp.f32 %v385_v33 }
 0x23b   :  { %v564_v34 = vpop.eup %563 }
 0x23c   :  { %v566_v35 = vpop.eup %565  ;;  %v406_v40 = vmul.f32 %v564_v34, %v399_v37 }
 0x23d   :  { %v407_v42 = vmul.f32 %v566_v35, %v399_v37 }
 0x23f   :  { %v568_v36 = vpop.eup %567 }
 0x240   :  { %v570_v39 = vpop.eup %569  ;;  %v408_v41 = vmul.f32 %v568_v36, %v404_v38 }
 0x241   :  { %v409_v43 = vmul.f32 %v570_v39, %v404_v38 }
 0x242   :  { %v410_v45 = vadd.f32 %v408_v41, %v406_v40 }
 0x243   :  { %v417_v46 = vadd.f32 %v409_v43, %v407_v42 }
 0x244   :  { %v411_v47 = vrot.slane %v410_v45, 4 }
 0x245   :  { %v418_v48 = vrot.slane %v417_v46, 4 }
 0x246   :  { %v412_v50 = vadd.f32 %v411_v47, %v410_v45 }
 0x247   :  { %v419_v51 = vadd.f32 %v418_v48, %v417_v46 }
 0x248   :  { %v413_v52 = vrot.slane %v412_v50, 2 }
 0x249   :  { %v420_v53 = vrot.slane %v419_v51, 2 }
 0x24a   :  { %v414_v57 = vadd.f32 %v413_v52, %v412_v50 }
 0x24b   :  { %v421_v59 = vadd.f32 %v420_v53, %v419_v51 }
 0x24c   :  { %v415_v60 = vrot.slane %v414_v57, 1 }
 0x24d   :  { %v422_v61 = vrot.slane %v421_v59, 1 }
 0x24e   :  { %v416_v0 = vadd.f32 %v415_v60, %v414_v57 }
 0x24f   :  { %v423_v1 = vadd.f32 %v422_v61, %v421_v59 }
 0x250   :  { %v434_v2 = vadd.f32 %v433_v63, %v416_v0 }
 0x251   :  { %v435_v3 = vadd.f32 %v433_v63, %v423_v1 }
 0x253   :  { %v438_v6 = vcombine.low %v434_v2, %v435_v3 }
 0x255   :  { %v445_v7 = vrot.slane %v438_v6, %v444_v4 }
 0x257   :  { %v452_v8 = vrot.slane %v445_v7, %v444_v4 }
 0x259   :  { %458 = vst.msk [vmem:[#allocation3] sm:$0x3] %vm456_vm2, %v452_v8 }
 0x25a   :  { %582 = shalt.err (!%p579_p4)
}
 0x25b   :  { %s583_s14 = scalar_lea.hbm %s819_s7, 32 }
 0x25c   :  { %p584_p5 = scmp.ne.s32.totalorder %s819_s7, %s583_s14  ;;  %p587_p6 = scmp.lt.u32.totalorder %s583_s14, %s819_s7 }
 0x25e   :  { %p589_p7 = pnand %p587_p6, %p584_p5 }
 0x260   :  { %592 = shalt.err (!%p589_p7)
}
 0x261   :  { %468 = dma.vmem_to_hbm [thread:$0]  %s466_s6, 32, %s819_s7, [#allocation4]  }
 0x262   :  { %593 = dma.done.wait [#allocation4], 32  }
 0x263   :  { %594 = vsyncadd [#allocation4], 4294967264 }
 0x264   :  { %472 = vsyncpa [#allocation4], 1 }

</bundles_post_ra>
